<compile_context>
chip_gen: v6e
topology: v6e:2x2x1
jax: 0.10.0
libtpu: 0.0.40
codegen_flags: <defaults>
</compile_context>

<pallas_src>
import functools
import math

import jax
import jax.numpy as jnp
from jax.experimental import pallas as pl
from jax.experimental.pallas import tpu as pltpu

LANE = 128


def _cdiv(a, b):
    return -(-a // b)


def _round_up(a, m):
    return _cdiv(a, m) * m


def _conv1d_same_kernel(x_ref, h_ref, w_ref, b_ref, o_ref, *, K):
    """One (batch, L-tile) grid step of Conv1d(padding='same'), NCL output.

    x_ref: (C_in, tl)       main input tile (channels on sublanes, L on lanes)
    h_ref: (C_in, 128)      the 128 input columns right after this tile
                            (only the first K-1 are consumed)
    w_ref: (K, C_out, C_in) per-tap weights, resident in VMEM
    b_ref: (C_out, 1)       bias, resident in VMEM
    o_ref: (C_out, tl)      output tile, lane-dense along L
    """
    tl = x_ref.shape[1]
    # Lane-aligned window [tile | next-128-cols]; a single aligned concat, no
    # (K*C_in, tl) sublane-stacked gather.
    win = jnp.concatenate([x_ref[...], h_ref[...]], axis=1)   # (C_in, tl + 128)
    # K accumulating MXU matmuls on shifted views, f32 accumulation throughout.
    acc = jnp.dot(w_ref[0], win[:, :tl], preferred_element_type=jnp.float32)
    for k in range(1, K):
        acc = acc + jnp.dot(w_ref[k], win[:, k:k + tl],
                            preferred_element_type=jnp.float32)
    acc = acc + b_ref[...].astype(jnp.float32)
    o_ref[...] = acc.astype(o_ref.dtype)


def _pick_tiling(L, N, C_in, C_out, K, itemsize, max_tile_l=None):
    """Pick (tl, T, vmem_limit_bytes) per TPU generation."""
    try:
        vmem_cap = int(pltpu.get_tpu_info().vmem_capacity_bytes)
    except Exception:
        vmem_cap = 64 * 1024 * 1024          # conservative (v7x per-core VMEM)
    # Scoped VMEM limit: generous on 128-MiB parts (v5e/v6e), <= ~38 MiB on v7x.
    vmem_limit = max(32 * 1024 * 1024, min(int(vmem_cap * 0.6), 100 * 1024 * 1024))

    # Rough per-lane-column VMEM bytes of one grid step: double-buffered in/out
    # tiles + window + up to K shifted operands + the f32 accumulator.
    per_col = itemsize * (2 * C_in + 2 * C_out + (K + 1) * C_in) + 4 * C_out
    tl_cap = ((vmem_limit // 2) // per_col) // LANE * LANE
    tl_cap = max(LANE, min(32768, tl_cap))   # 16K-32K lanes amortize step cost
    if max_tile_l is not None:
        assert max_tile_l % LANE == 0
        tl_cap = max(LANE, min(tl_cap, max_tile_l))

    L_up = _round_up(L, LANE)
    tl = min(L_up, tl_cap)
    if N == 1 and tl == L_up and L_up >= 2 * LANE:
        # v7x shards parallel grid axes across 2 TensorCores; give a single-row
        # input at least 2 grid steps. (Harmless on single-TC v5e/v6e.)
        tl = _round_up(_cdiv(L_up, 2), LANE)
    T = _cdiv(L, tl)
    return tl, T, vmem_limit


def conv1d_same_pallas(x_nlc, weight_oik, bias, *, max_tile_l=None):
    """Conv1d(C_in, C_out, K, padding='same') over channels-last input.

    x_nlc: (N, L, C_in); weight_oik: (C_out, C_in, K); bias: (C_out,)
    Returns (N, C_out, L) -- PyTorch's NCL output layout.
    """
    N, L, C_in = x_nlc.shape
    C_out, C_in_w, K = weight_oik.shape
    assert C_in_w == C_in

    left = (K - 1) // 2                       # PyTorch 'same': (left, right) = (1, 2) for K=4
    itemsize = jnp.dtype(x_nlc.dtype).itemsize
    tl, T, vmem_limit = _pick_tiling(L, N, C_in, C_out, K, itemsize, max_tile_l)
    tl_blocks = tl // LANE

    # NLC -> NCL (the module's permute) fused with the single zero pad that
    # provides both the 'same' padding and the per-tile halo: padded length is
    # T*tl + 128 so every main tile and its 128-column halo block reads
    # in-bounds, well-defined zeros past the end of the sequence.
    x_ncl = jnp.transpose(x_nlc, (0, 2, 1))                         # (N, C_in, L)
    pad_r = T * tl + LANE - left - L
    x_pad = jnp.pad(x_ncl, ((0, 0), (0, 0), (left, pad_r)))        # (N, C_in, T*tl + 128)

    w_koi = jnp.transpose(weight_oik, (2, 0, 1))                    # (K, C_out, C_in)
    b2 = bias.reshape(C_out, 1)

    out = pl.pallas_call(
        functools.partial(_conv1d_same_kernel, K=K),
        out_shape=jax.ShapeDtypeStruct((N, C_out, L), x_nlc.dtype),
        grid=(N, T),
        in_specs=[
            # main tile
            pl.BlockSpec((None, C_in, tl), lambda n, j: (n, 0, j)),
            # 128-column halo straight out of the same padded buffer
            pl.BlockSpec((None, C_in, LANE), lambda n, j: (n, 0, (j + 1) * tl_blocks)),
            # per-tap weights (resident: constant block index)
            pl.BlockSpec((K, C_out, C_in), lambda n, j: (0, 0, 0)),
            # bias (resident)
            pl.BlockSpec((C_out, 1), lambda n, j: (0, 0)),
        ],
        out_specs=pl.BlockSpec((None, C_out, tl), lambda n, j: (n, 0, j)),
        compiler_params=pltpu.CompilerParams(
            dimension_semantics=("parallel", "parallel"),
            vmem_limit_bytes=vmem_limit,
        ),
    )(x_pad, x_pad, w_koi, b2)
    return out


def wrap_conv1d_forward(x, weight_oik, bias, *, max_tile_l=None):
    """Mirrors WrapConv1d.forward.

    x: (N, L, C_in) -> (N, C_out, L)   [batched]
    x: (L, C_in)    -> (C_out, L)      [unbatched, x.dim() < 3]
    """
    if x.ndim < 3:
        return conv1d_same_pallas(x[None], weight_oik, bias, max_tile_l=max_tile_l)[0]
    return conv1d_same_pallas(x, weight_oik, bias, max_tile_l=max_tile_l)


if __name__ == "__main__":
    in_channels, out_channels, K = 4, 8, 4
    N, L = 2, 16

    key = jax.random.PRNGKey(0)
    kx, kw, kb, kx2 = jax.random.split(key, 4)

    # PyTorch default Conv1d init: U(-sqrt(k), sqrt(k)), k = 1/(C_in*kernel_size)
    bound = 1.0 / math.sqrt(in_channels * K)
    weight = jax.random.uniform(
        kw, (out_channels, in_channels, K), jnp.float32, -bound, bound)
    bias = jax.random.uniform(kb, (out_channels,), jnp.float32, -bound, bound)

    fwd = jax.jit(wrap_conv1d_forward, static_argnames=("max_tile_l",))

    def torch_ref(x_nlc):
        # Pure-JAX reference with PyTorch's exact conv semantics (NCL, OIK, pad (1,2)).
        x_ncl = jnp.transpose(x_nlc, (0, 2, 1))
        return jax.lax.conv_general_dilated(
            x_ncl, weight, window_strides=(1,), padding=[(1, 2)],
            dimension_numbers=("NCH", "OIH", "NCH")) + bias[None, :, None]

    # 1) small batched case (module's typical input, single L tile)
    x = jax.random.normal(kx, (N, L, in_channels), jnp.float32)
    out = jax.block_until_ready(fwd(x, weight, bias))
    ref = torch_ref(x)
    assert out.shape == (N, out_channels, L), out.shape
    assert jnp.allclose(out, ref, atol=1e-5, rtol=1e-5), float(jnp.max(jnp.abs(out - ref)))

    # 2) unbatched case (the x.dim() < 3 branch)
    out2 = jax.block_until_ready(fwd(x[0], weight, bias))
    assert out2.shape == (out_channels, L), out2.shape
    assert jnp.allclose(out2, ref[0], atol=1e-5, rtol=1e-5)

    # 3) longer, ragged sequence exercising the (N, L-tile) grid, the cross-tile
    #    halo blocks, and the clipped final output block (T=3, L % tl != 0)
    L_big = 1152
    x3 = jax.random.normal(kx2, (N, L_big, in_channels), jnp.float32)
    out3 = jax.block_until_ready(fwd(x3, weight, bias, max_tile_l=512))
    ref3 = torch_ref(x3)
    assert out3.shape == (N, out_channels, L_big), out3.shape
    assert jnp.allclose(out3, ref3, atol=1e-4, rtol=1e-4), float(jnp.max(jnp.abs(out3 - ref3)))

    print("KERNEL_OK")
</pallas_src>

<mosaic_0001>
module attributes {stable_mosaic.version = 11 : i64} {
  func.func @_conv1d_same_kernel(%arg0: i32, %arg1: i32, %arg2: memref<1x4x128xf32, #tpu.memory_space<vmem>>, %arg3: memref<1x4x128xf32, #tpu.memory_space<vmem>>, %arg4: memref<4x8x4xf32, #tpu.memory_space<vmem>>, %arg5: memref<8x1xf32, #tpu.memory_space<vmem>>, %arg6: memref<1x8x128xf32, #tpu.memory_space<vmem>>) attributes {dimension_semantics = [#tpu.dimension_semantics<parallel>, #tpu.dimension_semantics<parallel>], iteration_bounds = array<i64: 2, 1>, scalar_prefetch = 0 : i64, scratch_operands = 0 : i64, tpu.core_type = #tpu.core_type<tc>, window_params = [{transform_indices = @transform_0, window_bounds = array<i64: 1, 4, 128>}, {transform_indices = @transform_1, window_bounds = array<i64: 1, 4, 128>}, {pipeline_mode = #tpu.pipeline_mode<synchronous>, transform_indices = @transform_2, window_bounds = array<i64: 4, 8, 4>}, {pipeline_mode = #tpu.pipeline_mode<synchronous>, transform_indices = @transform_3, window_bounds = array<i64: 8, 1>}, {transform_indices = @transform_4, window_bounds = array<i64: 1, 8, 128>}]} {
    %c0 = arith.constant 0 : index
    %c0_0 = arith.constant 0 : index
    %c0_1 = arith.constant 0 : index
    %0 = vector.load %arg2[%c0, %c0_0, %c0_1] : memref<1x4x128xf32, #tpu.memory_space<vmem>>, vector<1x4x128xf32>
    %1 = vector.shape_cast %0 : vector<1x4x128xf32> to vector<4x128xf32>
    %c0_2 = arith.constant 0 : index
    %c0_3 = arith.constant 0 : index
    %c0_4 = arith.constant 0 : index
    %2 = vector.load %arg3[%c0_2, %c0_3, %c0_4] : memref<1x4x128xf32, #tpu.memory_space<vmem>>, vector<1x4x128xf32>
    %3 = vector.shape_cast %2 : vector<1x4x128xf32> to vector<4x128xf32>
    %4 = tpu.concatenate %1, %3 in 1 : vector<4x128xf32>, vector<4x128xf32> -> vector<4x256xf32>
    %c0_5 = arith.constant 0 : index
    %c0_6 = arith.constant 0 : index
    %c0_7 = arith.constant 0 : index
    %5 = vector.load %arg4[%c0_5, %c0_6, %c0_7] : memref<4x8x4xf32, #tpu.memory_space<vmem>>, vector<1x8x4xf32>
    %6 = vector.shape_cast %5 : vector<1x8x4xf32> to vector<8x4xf32>
    %7 = vector.extract_strided_slice %4 {offsets = [0, 0], sizes = [4, 128], strides = [1, 1]} : vector<4x256xf32> to vector<4x128xf32>
    %cst = arith.constant dense<0.000000e+00> : vector<8x128xf32>
    %8 = tpu.matmul %6, %7, %cst {dimension_numbers = #tpu.dot_dimension_numbers<[1], [0], [0], [1], [0, 0, 1, 1], [], []>} : vector<8x4xf32>, vector<4x128xf32>, vector<8x128xf32> -> vector<8x128xf32>
    %c1 = arith.constant 1 : index
    %c0_8 = arith.constant 0 : index
    %c0_9 = arith.constant 0 : index
    %9 = vector.load %arg4[%c1, %c0_8, %c0_9] : memref<4x8x4xf32, #tpu.memory_space<vmem>>, vector<1x8x4xf32>
    %10 = vector.shape_cast %9 : vector<1x8x4xf32> to vector<8x4xf32>
    %11 = vector.extract_strided_slice %4 {offsets = [0, 1], sizes = [4, 128], strides = [1, 1]} : vector<4x256xf32> to vector<4x128xf32>
    %cst_10 = arith.constant dense<0.000000e+00> : vector<8x128xf32>
    %12 = tpu.matmul %10, %11, %cst_10 {dimension_numbers = #tpu.dot_dimension_numbers<[1], [0], [0], [1], [0, 0, 1, 1], [], []>} : vector<8x4xf32>, vector<4x128xf32>, vector<8x128xf32> -> vector<8x128xf32>
    %13 = arith.addf %8, %12 : vector<8x128xf32>
    %c2 = arith.constant 2 : index
    %c0_11 = arith.constant 0 : index
    %c0_12 = arith.constant 0 : index
    %14 = vector.load %arg4[%c2, %c0_11, %c0_12] : memref<4x8x4xf32, #tpu.memory_space<vmem>>, vector<1x8x4xf32>
    %15 = vector.shape_cast %14 : vector<1x8x4xf32> to vector<8x4xf32>
    %16 = vector.extract_strided_slice %4 {offsets = [0, 2], sizes = [4, 128], strides = [1, 1]} : vector<4x256xf32> to vector<4x128xf32>
    %cst_13 = arith.constant dense<0.000000e+00> : vector<8x128xf32>
    %17 = tpu.matmul %15, %16, %cst_13 {dimension_numbers = #tpu.dot_dimension_numbers<[1], [0], [0], [1], [0, 0, 1, 1], [], []>} : vector<8x4xf32>, vector<4x128xf32>, vector<8x128xf32> -> vector<8x128xf32>
    %18 = arith.addf %13, %17 : vector<8x128xf32>
    %c3 = arith.constant 3 : index
    %c0_14 = arith.constant 0 : index
    %c0_15 = arith.constant 0 : index
    %19 = vector.load %arg4[%c3, %c0_14, %c0_15] : memref<4x8x4xf32, #tpu.memory_space<vmem>>, vector<1x8x4xf32>
    %20 = vector.shape_cast %19 : vector<1x8x4xf32> to vector<8x4xf32>
    %21 = vector.extract_strided_slice %4 {offsets = [0, 3], sizes = [4, 128], strides = [1, 1]} : vector<4x256xf32> to vector<4x128xf32>
    %cst_16 = arith.constant dense<0.000000e+00> : vector<8x128xf32>
    %22 = tpu.matmul %20, %21, %cst_16 {dimension_numbers = #tpu.dot_dimension_numbers<[1], [0], [0], [1], [0, 0, 1, 1], [], []>} : vector<8x4xf32>, vector<4x128xf32>, vector<8x128xf32> -> vector<8x128xf32>
    %23 = arith.addf %18, %22 : vector<8x128xf32>
    %c0_17 = arith.constant 0 : index
    %c0_18 = arith.constant 0 : index
    %24 = vector.load %arg5[%c0_17, %c0_18] : memref<8x1xf32, #tpu.memory_space<vmem>>, vector<8x1xf32>
    %25 = vector.broadcast %24 : vector<8x1xf32> to vector<8x128xf32>
    %26 = arith.addf %23, %25 : vector<8x128xf32>
    %c0_19 = arith.constant 0 : index
    %c0_20 = arith.constant 0 : index
    %c0_21 = arith.constant 0 : index
    %27 = vector.load %arg6[%c0_19, %c0_20, %c0_21] : memref<1x8x128xf32, #tpu.memory_space<vmem>>, vector<1x8x128xf32>
    %28 = vector.shape_cast %27 : vector<1x8x128xf32> to vector<8x128xf32>
    %29 = vector.shape_cast %26 : vector<8x128xf32> to vector<1x8x128xf32>
    tpu.vector_store %arg6[%c0_19, %c0_20, %c0_21], %29 {strides = array<i32>} : memref<1x8x128xf32, #tpu.memory_space<vmem>>, vector<1x8x128xf32>,
    return
  }
  func.func @transform_0(%arg0: i32, %arg1: i32) -> (i32, i32, i32) {
    %c0_i32 = arith.constant 0 : i32
    %c0_i32_0 = arith.constant 0 : i32
    return %arg0, %c0_i32, %arg1 : i32, i32, i32
  }
  func.func @transform_1(%arg0: i32, %arg1: i32) -> (i32, i32, i32) {
    %c1_i32 = arith.constant 1 : i32
    %0 = arith.addi %arg1, %c1_i32 : i32
    %c1_i32_0 = arith.constant 1 : i32
    %1 = arith.muli %0, %c1_i32_0 : i32
    %c0_i32 = arith.constant 0 : i32
    %c0_i32_1 = arith.constant 0 : i32
    return %arg0, %c0_i32, %1 : i32, i32, i32
  }
  func.func @transform_2(%arg0: i32, %arg1: i32) -> (i32, i32, i32) {
    %c0_i32 = arith.constant 0 : i32
    %c0_i32_0 = arith.constant 0 : i32
    %c0_i32_1 = arith.constant 0 : i32
    %c0_i32_2 = arith.constant 0 : i32
    return %c0_i32, %c0_i32_0, %c0_i32_1 : i32, i32, i32
  }
  func.func @transform_3(%arg0: i32, %arg1: i32) -> (i32, i32) {
    %c0_i32 = arith.constant 0 : i32
    %c0_i32_0 = arith.constant 0 : i32
    %c0_i32_1 = arith.constant 0 : i32
    return %c0_i32, %c0_i32_0 : i32, i32
  }
  func.func @transform_4(%arg0: i32, %arg1: i32) -> (i32, i32, i32) {
    %c0_i32 = arith.constant 0 : i32
    %c0_i32_0 = arith.constant 0 : i32
    return %arg0, %c0_i32, %arg1 : i32, i32, i32
  }
}

</mosaic_0001>

<bundles_post_ra>
// kernel: wrap_conv1d_forward.1
= control target key start
LH: loop header
LB: loop body
LE: loop exit
PB: predicated region body
PF: predicated region fallthrough
CT: control target
= control target key end

     0   :  { %9 = vsyncpa [#allocation3], 0  ;;  %s1065_s0 = inlined_call_operand.vmem [shape: f32[2,4,256], index: 0, kind: input, shape index: {}, may-alias: {0,1}]   ;;  %s1066_s1 = inlined_call_operand.vmem [shape: f32[2,4,256], index: 1, kind: input, shape index: {}, may-alias: {0,1}]   ;;  %s1067_s2 = inlined_call_operand.vmem [shape: f32[4,8,4], index: 2, kind: input, shape index: {}]   ;;  %s1068_s3 = inlined_call_operand.vmem [shape: f32[8,1], index: 3, kind: input, shape index: {}]   ;;  %s1069_s4 = inlined_call_operand.hbm [shape: f32[2,8,16], index: 4, kind: output, shape index: {}]  }
   0x1   :  { %11 = vsyncpa [#allocation3 + $0x1], 0  ;;  %s936_s15 = smov 0   ;;  %s938_s16 = smov 0  }
   0x2   :  { %s940_s17 = smov 0   ;;  %s942_s18 = smov 0  }
   0x3   :  { %s944_s19 = smov 0   ;;  %s946_s20 = smov 0  }
   0x4 LB: > { %s707_s21 = sadd.s32 4294967295, %s902_s20   ;;  %s708_s22 = sadd.s32 4294967294, %s902_s20   ;;  %s902_s20 = sphi %s946_s20, %s17_s20   ;;  %s898_s19 = sphi %s944_s19, %s1076_s19   ;;  %s894_s18 = sphi %s942_s18, %s1075_s18   ;;  %s890_s17 = sphi %s940_s17, %s1074_s17   ;;  %s886_s16 = sphi %s938_s16, %s1073_s16   ;;  %s882_s15 = sphi %s936_s15, %s1072_s15  }
   0x5   : > { %s29_s23 = sadd.s32 1, %s898_s19  ;;  %s138_s24 = sadd.s32 1, %s890_s17 }
   0x6   : > { %p31_p0 = scmp.ge.s32.totalorder %s29_s23, 2  ;;  %p148_p1 = scmp.ne.s32.totalorder %s890_s17, %s886_s16 }
   0x7   : > { %p149_p2 = scmp.eq.s32.totalorder %s707_s21, 1  ;;  %p154_p3 = scmp.ne.s32.totalorder %s886_s16, %s882_s15 }
   0x8   : > { %s1078_s23 = smov (%p31_p0, %s29_s23), 0  ;;  %p155_p5 = scmp.eq.s32.totalorder %s708_s22, 1 }
   0x9   : > { %p976_p4 = por %p149_p2, %p148_p1  ;;  %s133_s26 = ssub.s32 %s898_s19, %s1078_s23 }
   0xa   : > { %p711_p6 = scmp.ge.s32.totalorder %s902_s20, 1  ;;  %p136_p7 = scmp.eq.s32.totalorder %s133_s26, 0 }
   0xb   : > { %p983_p8 = por %p155_p5, %p154_p3  ;;  %p203_p9 = scmp.lt.s32.totalorder %s902_s20, 3 }
   0xc   : > { %s989_s28 = scalar_select %p136_p7, %s890_s17, %s138_s24  }
   0xd   : > { %p204_p10 = pnand %p711_p6, %p203_p9 }
   0xe   : > { %p241_p11 = scmp.lt.s32.totalorder (!%p204_p10), %s894_s18, 1  ;;  %s907_s14 = smov (!%p204_p10), 126  }
   0xf   : > { %207 = sbr.rel (%p204_p10) target bundleno = 362 (0x16a), region = 36  ;;  %s908_s21 = smov (!%p204_p10), 127  }
  0x10   : > { %s909_s22 = smov (!%p204_p10), 125   ;;  %s238_s9 = sand.u32 (!%p204_p10), 1, %s886_s16  }
  0x11   : > { %s712_s10 = sshll.u32 (!%p204_p10), %s238_s9, 3  ;;  %s601_s24 = scalar_lea.sflag (!%p204_p10), [#allocation3], %s238_s9 }
  0x12   : > { %s240_s12 = scalar_lea.vmem (!%p204_p10), [#allocation2], %s712_s10 }
  0x13   : > { %s615_s13 = sshll.u32 (!%p204_p10), %s240_s12, 4  ;;  %s616_s13 = int_to_ptr.vmem [resolvable:$true] %s615_s13 }
  0x14   : > { %v904_v0 = vmov 0.0   ;;  %s242_s29 = scalar_select %p241_p11, %s894_s18, 1  ;;  %vm905_vm0 = vmmov 0   ;;  %vm276_vm1 = vcmask 1043456   ;;  %v906_v1 = vmov 0   ;;  %v261_v3 = vld [vmem:[%s1067_s2] sm:$0xff] }
  0x15   : > { %744 = vmatprep.subr.mxu0 %v904_v0  ;;  %749 = vmatprep.subr.mxu1 %v904_v0  ;;  %vm272_vm2 = vcmask 31744   ;;  %v592_v5 = vld [vmem:[%s1068_s3] sm:$0xff]  ;;  %vm270_vm3 = vcmask 1039360   ;;  %vm430_vm4 = vcmask 1031168   ;;  %v717_v10 = vld [vmem:[%s1067_s2 + $0x8] sm:$0xff]  ;;  %vm514_vm5 = vcmask 1022976  }
  0x16   : > { %746 = vmatprep.mubr.msk.f32.mxu0 %vm905_vm0, %v904_v0  ;;  %751 = vmatprep.mubr.msk.f32.mxu1 %vm905_vm0, %v904_v0  ;;  %s732_s30 = sshll.u32 %s242_s29, 3  ;;  %v722_v15 = vld [vmem:[%s1067_s2 + $0x10] sm:$0xff]  ;;  %v725_v16 = vld [vmem:[%s1067_s2 + $0x18] sm:$0xff]  ;;  %s826_s26 = scalar_lea.vmem %s616_s13, 128 }
  0x17   : > { %s248_s7 = scalar_lea.vmem %s1065_s0, %s732_s30  ;;  %s734_s8 = sadd.s32 4, %s732_s30  ;;  %825 = vset.pattern.permute.xlu0 %v906_v1 }
  0x18   : > { %v259_v2 = vld [vmem:[%s248_s7] sm:$0xf]  ;;  %s257_s11 = scalar_lea.vmem %s1066_s1, %s734_s8  ;;  %p827_p12 = scmp.ne.s32.totalorder %s616_s13, %s826_s26 }
  0x19   : > { %426 = vrot.lane.b32.xlu1 %v259_v2, %s907_s14  ;;  %266 = vrot.lane.b32.xlu0 %v259_v2, %s908_s21  ;;  %v260_v4 = vld [vmem:[%s257_s11] sm:$0xf]  ;;  %s729_s11 = sshll.u32 %s894_s18, 7  ;;  %s910_s29 = smov [#allocation2]  }
  0x1a   : > { %750 = vmatpush3.msk.msra.mxu1 %vm276_vm1, %v259_v2  ;;  %p828_p13 = pnand %p827_p12, %p976_p4  ;;  %s830_s30 = sshll.u32 %s910_s29, 4  ;;  %s831_s30 = int_to_ptr.vmem [resolvable:$false] %s830_s30 }
  0x1b   : > { %752 = vmatmul.mubr.msk.f32.vlgmr.msra.gmra.mxu1 %vm272_vm2, %v261_v3  ;;  %759 = vmatprep.subr.mxu1 %v904_v0  ;;  %s832_s18 = scalar_lea.vmem %s831_s30, 256  ;;  %p833_p1 = scmp.lt.s32.totalorder %s616_s13, %s831_s30 }
  0x1c   : > { %761 = vmatprep.mubr.msk.f32.mxu1 %vm905_vm0, %v904_v0  ;;  %p829_p0 = pneg %p828_p13  ;;  %p834_p2 = scmp.lt.s32.totalorder %s832_s18, %s826_s26 }
  0x1d   : > { %428 = vrot.lane.b32.xlu1 %v260_v4, %s907_s14  ;;  %268 = vrot.lane.b32.xlu0 %v260_v4, %s908_s21 }
  0x1e   : > { %p835_p3 = por %p834_p2, %p833_p1 }
  0x20   : > { %p836_p5 = pnand %p835_p3, %p829_p0 }
  0x21   : > { %512 = vrot.lane.b32.xlu1 %v260_v4, %s909_s22  ;;  %510 = vrot.lane.b32.xlu0 %v259_v2, %s909_s22  ;;  %s613_s22 = scalar_lea.hbm %s1069_s4, %s729_s11 }
  0x25   : > { %595 = vperm.xlu0 %825, %v592_v5  }
  0x8b   : > { %v427_v6 = vpop.permute.xlu1 %426  ;;  %v267_v7 = vpop.permute.xlu0 %266 }
  0x8f   : > { %v429_v8 = vpop.permute.xlu1 %428  ;;  %v269_v9 = vpop.permute.xlu0 %268 }
  0x90   : > { %v271_v11 = vsel %vm270_vm3, %v267_v7, %v269_v9  ;;  %v431_v12 = vsel %vm430_vm4, %v427_v6, %v429_v8 }
  0x91   : > { %745 = vmatpush3.msk.msra.mxu0 %vm276_vm1, %v271_v11 }
  0x92   : > { %747 = vmatmul.mubr.msk.f32.vlgmr.msra.gmra.mxu0 %vm272_vm2, %v717_v10  ;;  %754 = vmatprep.subr.mxu0 %v904_v0 }
  0x93   : > { %v513_v13 = vpop.permute.xlu1 %512  ;;  %755 = vmatpush3.msk.msra.mxu0 %vm276_vm1, %v431_v12  ;;  %v511_v14 = vpop.permute.xlu0 %510  ;;  %756 = vmatprep.mubr.msk.f32.mxu0 %vm905_vm0, %v904_v0 }
  0x94   : > { %v515_v17 = vsel %vm514_vm5, %v511_v14, %v513_v13 }
  0x95   : > { %760 = vmatpush3.msk.msra.mxu1 %vm276_vm1, %v515_v17 }
  0x96   : > { %757 = vmatmul.mubr.msk.f32.vlgmr.msra.gmra.mxu0 %vm272_vm2, %v722_v15  ;;  %762 = vmatmul.mubr.msk.f32.vlgmr.msra.gmra.mxu1 %vm272_vm2, %v725_v16 }
  0xa0   : > { %v596_v26 = vpop.permute.xlu0 %595 }
  0xdb   : > { %v420_v18 = vpop.f32.mrf.mxu1 }
  0xdd   : > { %v753_v19 = vpop.f32.mrf.mxu1 }
 0x152   : > { %v345_v20 = vpop.f32.mrf.mxu0 }
 0x153   : > { %v421_v22 = vadd.f32 %v420_v18, %v345_v20 }
 0x154   : > { %v748_v21 = vpop.f32.mrf.mxu0 }
 0x156   : > { %v503_v23 = vpop.f32.mrf.mxu0  ;;  %v587_v24 = vpop.f32.mrf.mxu1 }
 0x157   : > { %v507_v25 = vadd.f32 %v503_v23, %v421_v22 }
 0x158   : > { %v758_v27 = vpop.f32.mrf.mxu0  ;;  %v763_v28 = vpop.f32.mrf.mxu1 }
 0x159   : > { %v591_v29 = vadd.f32 %v587_v24, %v507_v25 }
 0x15b   : > { %v598_v30 = vadd.f32 %v596_v26, %v591_v29 }
 0x15d   : > { %599 = vst [vmem:[%s240_s12] sm:$0xff] %v598_v30 }
 0x15e   : > { %839 = shalt.err (!%p836_p5)
}
 0x15f   : > { %s840_s5 = scalar_lea.hbm %s613_s22, 128  ;;  %s844_s8 = scalar_lea.hbm %s1069_s4, 256 }
 0x160   : > { %p841_p6 = scmp.ne.s32.totalorder %s613_s22, %s840_s5  ;;  %p845_p10 = scmp.lt.s32.totalorder %s613_s22, %s1069_s4 }
 0x161   : > { %p846_p11 = scmp.lt.s32.totalorder %s844_s8, %s840_s5 }
 0x162   : > { %p842_p7 = pnand %p841_p6, %p976_p4 }
 0x163   : > { %p847_p12 = por %p846_p11, %p845_p10 }
 0x164   : > { %p843_p9 = pneg %p842_p7 }
 0x166   : > { %p848_p13 = pnand %p847_p12, %p843_p9 }
 0x168   : > { %851 = shalt.err (!%p848_p13)
}
 0x169   : > { %764 = dma.vmem_to_hbm [thread:$0]  (%p976_p4), %s616_s13, 128, %s613_s22, %s601_s24  }
 0x16a PF: > { %p770_p0 = scmp.ge.s32.totalorder %s902_s20, 2  ;;  %s627_s11 = sand.u32 1, %s882_s15  }
 0x16b   : > { %s628_s12 = scalar_lea.sflag [#allocation3], %s627_s11 }
 0x16c   : > { %p767_p1 = pnand %p770_p0, %p983_p8 }
 0x16e   : > { %p768_p2 = pneg %p767_p1 }
 0x170   : > { %877 = dma.done.wait (%p768_p2), %s628_s12, 128  }
 0x171   : > { %879 = vsyncadd (%p768_p2), %s628_s12, 4294967168  ;;  %s17_s20 = sadd.s32 1, %s902_s20   ;;  %s1072_s15 = smov %s886_s16 }
 0x172   : > { %p14_p3 = scmp.ge.s32.totalorder %s17_s20, 4   ;;  %s1073_s16 = smov %s890_s17 }
 0x173   : > { %s1074_s17 = smov %s989_s28  ;;  %s1075_s18 = smov %s898_s19 }
 0x174   : > { %s1076_s19 = smov %s1078_s23  ;;  %16 = sbr.rel (!%p14_p3) target bundleno = 4 (0x4), region = 77 }
 0x179   :  { %633 = vsyncpa [#allocation3], 1 }
 0x17a   :  { %635 = vsyncpa [#allocation3 + $0x1], 1 }

</bundles_post_ra>
